<compile_context>
chip_gen: v5e
topology: v5e:2x2
jax: 0.10.0
libtpu: 0.0.40
codegen_flags: <defaults>
</compile_context>

<pallas_src>
import jax
import jax.numpy as jnp
from jax.experimental import pallas as pl
from jax.experimental.pallas import tpu as pltpu


def _round_up(n, m):
    return ((n + m - 1) // m) * m


def _cdiv(a, b):
    return -(-a // b)


def _mlp4_kernel(x_ref, w1_ref, b1_ref, w2_ref, b2_ref,
                 w3_ref, b3_ref, w4_ref, b4_ref, out_ref):
    # All four layers fused on-chip; matmuls accumulate in f32 on the MXU.
    cdt = w1_ref.dtype
    h = x_ref[...]
    h = jnp.dot(h, w1_ref[...], preferred_element_type=jnp.float32) + b1_ref[...]
    h = jnp.maximum(h, 0.0).astype(cdt)
    h = jnp.dot(h, w2_ref[...], preferred_element_type=jnp.float32) + b2_ref[...]
    h = jnp.maximum(h, 0.0).astype(cdt)
    h = jnp.dot(h, w3_ref[...], preferred_element_type=jnp.float32) + b3_ref[...]
    h = jnp.maximum(h, 0.0).astype(cdt)
    out = jnp.dot(h, w4_ref[...], preferred_element_type=jnp.float32) + b4_ref[...]
    out_ref[...] = out.astype(out_ref.dtype)


def _sublane_multiple(dtype):
    return 16 if jnp.dtype(dtype) == jnp.dtype(jnp.bfloat16) else 8


def prepare_params(params, compute_dtype=jnp.bfloat16):
    """One-time layout glue (hoisted out of the forward hot path).

    params = (w1, b1, w2, b2, w3, b3, w4, b4) in PyTorch nn.Linear convention
    (w_i: (out, in), b_i: (out,)).  Returns layers as ((in_pad, out_pad) weight,
    (1, out_pad) f32 bias).  Layer-1's input dim is only rounded up to the compute
    dtype's sublane multiple (no 96->128 K padding); hidden/output dims are padded
    to 128 lanes.  Zero padding is numerically inert through the ReLU chain.
    """
    sub = _sublane_multiple(compute_dtype)
    layers = []
    for idx, (w, b) in enumerate(zip(params[0::2], params[1::2])):
        out_f, in_f = w.shape
        in_p = _round_up(in_f, sub) if idx == 0 else _round_up(in_f, 128)
        out_p = _round_up(out_f, 128)
        wp = jnp.zeros((in_p, out_p), compute_dtype)
        wp = wp.at[:in_f, :out_f].set(w.T.astype(compute_dtype))
        bp = jnp.zeros((1, out_p), jnp.float32)
        bp = bp.at[0, :out_f].set(b.astype(jnp.float32))
        layers.append((wp, bp))
    return tuple(layers)


def _choose_tile(b, tile_b, sub, max_tile=4096):
    # Largest tile that divides the (padded) batch reasonably; capped so the fused
    # f32 intermediates + double-buffered in/out blocks stay inside default scoped
    # VMEM on every generation (v5e 16 MiB, v6e/v7x 32 MiB).
    tile = min(_round_up(min(tile_b, max_tile), sub), _round_up(b, sub))
    steps = _cdiv(b, tile)
    if steps > 1 and steps % 2 == 1:
        # Rebalance to an even number of grid steps so v7x's 2 TensorCores split evenly.
        tile = _round_up(_cdiv(b, steps + 1), sub)
    return tile


def fully_connected_3l_forward(x, time_features, station_features, prepared_layers,
                               n_predictions, use_sti=False, use_time_data=False,
                               tile_b=1024, out_dtype=None):
    """x is NCHW; flattened row-major exactly like torch's x.view(-1, num_flat_features)."""
    b = x.shape[0]
    x_flat = x.reshape(b, -1)

    # addNonGridFeatures (glue; only the no-extra-features config is dim-consistent downstream)
    if use_sti and use_time_data:
        x_flat = jnp.concatenate([x_flat, time_features, station_features], axis=1)
    elif use_sti:
        x_flat = jnp.concatenate([x_flat, station_features], axis=1)
    elif use_time_data:
        x_flat = jnp.concatenate([x_flat, time_features], axis=1)

    (w1, b1), (w2, b2), (w3, b3), (w4, b4) = prepared_layers
    compute_dtype = w1.dtype
    out_dtype = compute_dtype if out_dtype is None else out_dtype
    k1 = w1.shape[0]              # layer-1 input width (sublane-rounded, NOT 128-padded)
    out_p = w4.shape[1]
    feat = x_flat.shape[1]
    assert feat <= k1, (feat, k1)

    sub = _sublane_multiple(compute_dtype)
    tile = _choose_tile(b, tile_b, sub)
    b_pad = _round_up(b, tile)

    # Fuse cast + (batch / tiny-K) padding; no zeros().at[].set() materialization.
    x_in = jnp.pad(x_flat.astype(compute_dtype), ((0, b_pad - b), (0, k1 - feat)))

    const = lambda i: (0, 0)   # weights/biases: same block every grid step -> VMEM-resident
    row = lambda i: (i, 0)     # activations: stream one batch tile per grid step

    out = pl.pallas_call(
        _mlp4_kernel,
        out_shape=jax.ShapeDtypeStruct((b_pad, out_p), out_dtype),
        grid=(b_pad // tile,),
        in_specs=[
            pl.BlockSpec((tile, k1), row),
            pl.BlockSpec(w1.shape, const), pl.BlockSpec(b1.shape, const),
            pl.BlockSpec(w2.shape, const), pl.BlockSpec(b2.shape, const),
            pl.BlockSpec(w3.shape, const), pl.BlockSpec(b3.shape, const),
            pl.BlockSpec(w4.shape, const), pl.BlockSpec(b4.shape, const),
        ],
        out_specs=pl.BlockSpec((tile, out_p), row),
        compiler_params=pltpu.CompilerParams(dimension_semantics=("parallel",)),
    )(x_in, w1, b1, w2, b2, w3, b3, w4, b4)

    return out[:b, :n_predictions]


def _torch_linear_init(key, out_features, in_features):
    # Deterministic stand-in for nn.Linear's default uniform(-1/sqrt(in), 1/sqrt(in)) init.
    kw, kb = jax.random.split(key)
    bound = 1.0 / jnp.sqrt(jnp.float32(in_features))
    w = jax.random.uniform(kw, (out_features, in_features), jnp.float32, -bound, bound)
    bias = jax.random.uniform(kb, (out_features,), jnp.float32, -bound, bound)
    return w, bias


def _reference_forward(x, params, compute_dtype=jnp.float32):
    # Pure-JAX reference mirroring the kernel's dtype path (f32 accumulation).
    w1, b1, w2, b2, w3, b3, w4, b4 = params

    def layer(h, w, b, relu=True):
        y = jnp.dot(h.astype(compute_dtype), w.T.astype(compute_dtype),
                    preferred_element_type=jnp.float32) + b.astype(jnp.float32)
        return jnp.maximum(y, 0.0).astype(compute_dtype) if relu else y

    h = x.reshape(x.shape[0], -1)
    h = layer(h, w1, b1)
    h = layer(h, w2, b2)
    h = layer(h, w3, b3)
    return layer(h, w4, b4, relu=False)


if __name__ == "__main__":
    # Module hyper-parameters (small, consistent with the __init__ signature).
    n_parameters = 3
    n_time_invariant_parameters = 2
    n_grid = 4
    n_fc1, n_fc2, n_fc3 = 64, 48, 32
    prediction_times = (1, 2, 3)
    n_predictions = len(prediction_times)
    use_sti, use_time_data = False, False  # only dimension-consistent config (see note above)

    in_channels = n_parameters + 1 + n_time_invariant_parameters          # 6
    flat_features = in_channels * n_grid * n_grid                          # 96

    key = jax.random.PRNGKey(0)
    k_x, k_x2, k_tf, k_sf, k1, k2, k3, k4 = jax.random.split(key, 8)

    w1, b1 = _torch_linear_init(k1, n_fc1, flat_features)
    w2, b2 = _torch_linear_init(k2, n_fc2, n_fc1)
    w3, b3 = _torch_linear_init(k3, n_fc3, n_fc2)
    w4, b4 = _torch_linear_init(k4, n_predictions, n_fc3)
    params = (w1, b1, w2, b2, w3, b3, w4, b4)

    # --- Run 1: f32 path, tiny batch (the module's toy config), f32 output ---
    batch = 2
    x = jax.random.normal(k_x, (batch, in_channels, n_grid, n_grid), jnp.float32)
    time_features = jax.random.normal(k_tf, (batch, 5), jnp.float32)       # n_time_features
    station_features = jax.random.normal(k_sf, (batch, 3), jnp.float32)    # n_station_features

    layers_f32 = prepare_params(params, compute_dtype=jnp.float32)
    out = fully_connected_3l_forward(x, time_features, station_features, layers_f32,
                                     n_predictions, use_sti, use_time_data)
    out = jax.block_until_ready(out)
    ref = _reference_forward(x, params, compute_dtype=jnp.float32)
    assert out.shape == (batch, n_predictions), out.shape
    assert jnp.allclose(out, ref, atol=1e-3, rtol=1e-3), float(jnp.abs(out - ref).max())

    # --- Run 2: bf16 path (bf16 weights/activations/output, f32 MXU accumulation),
    #     larger ragged batch exercising batch padding + the default large tile ---
    batch2 = 300
    x2 = jax.random.normal(k_x2, (batch2, in_channels, n_grid, n_grid), jnp.float32)
    tf2 = jnp.zeros((batch2, 5), jnp.float32)
    sf2 = jnp.zeros((batch2, 3), jnp.float32)

    layers_bf16 = prepare_params(params, compute_dtype=jnp.bfloat16)
    out2 = fully_connected_3l_forward(x2, tf2, sf2, layers_bf16, n_predictions,
                                      use_sti, use_time_data)
    out2 = jax.block_until_ready(out2)
    ref2 = _reference_forward(x2, params, compute_dtype=jnp.bfloat16).astype(jnp.float32)
    assert out2.shape == (batch2, n_predictions), out2.shape
    assert jnp.allclose(out2.astype(jnp.float32), ref2, atol=3e-2, rtol=3e-2), \
        float(jnp.abs(out2.astype(jnp.float32) - ref2).max())

    print("KERNEL_OK")
</pallas_src>

<mosaic_0001>
module attributes {stable_mosaic.version = 11 : i64} {
  func.func @_mlp4_kernel(%arg0: i32, %arg1: memref<8x96xf32, #tpu.memory_space<vmem>>, %arg2: memref<96x128xf32, #tpu.memory_space<vmem>>, %arg3: memref<1x128xf32, #tpu.memory_space<vmem>>, %arg4: memref<128x128xf32, #tpu.memory_space<vmem>>, %arg5: memref<1x128xf32, #tpu.memory_space<vmem>>, %arg6: memref<128x128xf32, #tpu.memory_space<vmem>>, %arg7: memref<1x128xf32, #tpu.memory_space<vmem>>, %arg8: memref<128x128xf32, #tpu.memory_space<vmem>>, %arg9: memref<1x128xf32, #tpu.memory_space<vmem>>, %arg10: memref<8x128xf32, #tpu.memory_space<vmem>>) attributes {dimension_semantics = [#tpu.dimension_semantics<parallel>], iteration_bounds = array<i64: 1>, scalar_prefetch = 0 : i64, scratch_operands = 0 : i64, tpu.core_type = #tpu.core_type<tc>, window_params = [{transform_indices = @transform_0, window_bounds = array<i64: 8, 96>}, {pipeline_mode = #tpu.pipeline_mode<synchronous>, transform_indices = @transform_1, window_bounds = array<i64: 96, 128>}, {pipeline_mode = #tpu.pipeline_mode<synchronous>, transform_indices = @transform_2, window_bounds = array<i64: 1, 128>}, {pipeline_mode = #tpu.pipeline_mode<synchronous>, transform_indices = @transform_3, window_bounds = array<i64: 128, 128>}, {pipeline_mode = #tpu.pipeline_mode<synchronous>, transform_indices = @transform_4, window_bounds = array<i64: 1, 128>}, {pipeline_mode = #tpu.pipeline_mode<synchronous>, transform_indices = @transform_5, window_bounds = array<i64: 128, 128>}, {pipeline_mode = #tpu.pipeline_mode<synchronous>, transform_indices = @transform_6, window_bounds = array<i64: 1, 128>}, {pipeline_mode = #tpu.pipeline_mode<synchronous>, transform_indices = @transform_7, window_bounds = array<i64: 128, 128>}, {pipeline_mode = #tpu.pipeline_mode<synchronous>, transform_indices = @transform_8, window_bounds = array<i64: 1, 128>}, {transform_indices = @transform_9, window_bounds = array<i64: 8, 128>}]} {
    %c0 = arith.constant 0 : index
    %c0_0 = arith.constant 0 : index
    %0 = vector.load %arg1[%c0, %c0_0] : memref<8x96xf32, #tpu.memory_space<vmem>>, vector<8x96xf32>
    %c0_1 = arith.constant 0 : index
    %c0_2 = arith.constant 0 : index
    %1 = vector.load %arg2[%c0_1, %c0_2] : memref<96x128xf32, #tpu.memory_space<vmem>>, vector<96x128xf32>
    %cst = arith.constant dense<0.000000e+00> : vector<8x128xf32>
    %2 = tpu.matmul %0, %1, %cst {dimension_numbers = #tpu.dot_dimension_numbers<[1], [0], [0], [1], [0, 0, 1, 1], [], []>} : vector<8x96xf32>, vector<96x128xf32>, vector<8x128xf32> -> vector<8x128xf32>
    %c0_3 = arith.constant 0 : index
    %c0_4 = arith.constant 0 : index
    %3 = vector.load %arg3[%c0_3, %c0_4] : memref<1x128xf32, #tpu.memory_space<vmem>>, vector<1x128xf32>
    %4 = vector.broadcast %3 : vector<1x128xf32> to vector<8x128xf32>
    %5 = arith.addf %2, %4 : vector<8x128xf32>
    %cst_5 = arith.constant 0.000000e+00 : f32
    %6 = vector.broadcast %cst_5 : f32 to vector<8x128xf32>
    %7 = arith.maximumf %5, %6 : vector<8x128xf32>
    %c0_6 = arith.constant 0 : index
    %c0_7 = arith.constant 0 : index
    %8 = vector.load %arg4[%c0_6, %c0_7] : memref<128x128xf32, #tpu.memory_space<vmem>>, vector<128x128xf32>
    %cst_8 = arith.constant dense<0.000000e+00> : vector<8x128xf32>
    %9 = tpu.matmul %7, %8, %cst_8 {dimension_numbers = #tpu.dot_dimension_numbers<[1], [0], [0], [1], [0, 0, 1, 1], [], []>} : vector<8x128xf32>, vector<128x128xf32>, vector<8x128xf32> -> vector<8x128xf32>
    %c0_9 = arith.constant 0 : index
    %c0_10 = arith.constant 0 : index
    %10 = vector.load %arg5[%c0_9, %c0_10] : memref<1x128xf32, #tpu.memory_space<vmem>>, vector<1x128xf32>
    %11 = vector.broadcast %10 : vector<1x128xf32> to vector<8x128xf32>
    %12 = arith.addf %9, %11 : vector<8x128xf32>
    %cst_11 = arith.constant 0.000000e+00 : f32
    %13 = vector.broadcast %cst_11 : f32 to vector<8x128xf32>
    %14 = arith.maximumf %12, %13 : vector<8x128xf32>
    %c0_12 = arith.constant 0 : index
    %c0_13 = arith.constant 0 : index
    %15 = vector.load %arg6[%c0_12, %c0_13] : memref<128x128xf32, #tpu.memory_space<vmem>>, vector<128x128xf32>
    %cst_14 = arith.constant dense<0.000000e+00> : vector<8x128xf32>
    %16 = tpu.matmul %14, %15, %cst_14 {dimension_numbers = #tpu.dot_dimension_numbers<[1], [0], [0], [1], [0, 0, 1, 1], [], []>} : vector<8x128xf32>, vector<128x128xf32>, vector<8x128xf32> -> vector<8x128xf32>
    %c0_15 = arith.constant 0 : index
    %c0_16 = arith.constant 0 : index
    %17 = vector.load %arg7[%c0_15, %c0_16] : memref<1x128xf32, #tpu.memory_space<vmem>>, vector<1x128xf32>
    %18 = vector.broadcast %17 : vector<1x128xf32> to vector<8x128xf32>
    %19 = arith.addf %16, %18 : vector<8x128xf32>
    %cst_17 = arith.constant 0.000000e+00 : f32
    %20 = vector.broadcast %cst_17 : f32 to vector<8x128xf32>
    %21 = arith.maximumf %19, %20 : vector<8x128xf32>
    %c0_18 = arith.constant 0 : index
    %c0_19 = arith.constant 0 : index
    %22 = vector.load %arg8[%c0_18, %c0_19] : memref<128x128xf32, #tpu.memory_space<vmem>>, vector<128x128xf32>
    %cst_20 = arith.constant dense<0.000000e+00> : vector<8x128xf32>
    %23 = tpu.matmul %21, %22, %cst_20 {dimension_numbers = #tpu.dot_dimension_numbers<[1], [0], [0], [1], [0, 0, 1, 1], [], []>} : vector<8x128xf32>, vector<128x128xf32>, vector<8x128xf32> -> vector<8x128xf32>
    %c0_21 = arith.constant 0 : index
    %c0_22 = arith.constant 0 : index
    %24 = vector.load %arg9[%c0_21, %c0_22] : memref<1x128xf32, #tpu.memory_space<vmem>>, vector<1x128xf32>
    %25 = vector.broadcast %24 : vector<1x128xf32> to vector<8x128xf32>
    %26 = arith.addf %23, %25 : vector<8x128xf32>
    %c0_23 = arith.constant 0 : index
    %c0_24 = arith.constant 0 : index
    %27 = vector.load %arg10[%c0_23, %c0_24] : memref<8x128xf32, #tpu.memory_space<vmem>>, vector<8x128xf32>
    tpu.vector_store %arg10[%c0_23, %c0_24], %26 {strides = array<i32>} : memref<8x128xf32, #tpu.memory_space<vmem>>, vector<8x128xf32>,
    return
  }
  func.func @transform_0(%arg0: i32) -> (i32, i32) {
    %c0_i32 = arith.constant 0 : i32
    %c0_i32_0 = arith.constant 0 : i32
    return %arg0, %c0_i32 : i32, i32
  }
  func.func @transform_1(%arg0: i32) -> (i32, i32) {
    %c0_i32 = arith.constant 0 : i32
    %c0_i32_0 = arith.constant 0 : i32
    %c0_i32_1 = arith.constant 0 : i32
    return %c0_i32, %c0_i32_0 : i32, i32
  }
  func.func @transform_2(%arg0: i32) -> (i32, i32) {
    %c0_i32 = arith.constant 0 : i32
    %c0_i32_0 = arith.constant 0 : i32
    %c0_i32_1 = arith.constant 0 : i32
    return %c0_i32, %c0_i32_0 : i32, i32
  }
  func.func @transform_3(%arg0: i32) -> (i32, i32) {
    %c0_i32 = arith.constant 0 : i32
    %c0_i32_0 = arith.constant 0 : i32
    %c0_i32_1 = arith.constant 0 : i32
    return %c0_i32, %c0_i32_0 : i32, i32
  }
  func.func @transform_4(%arg0: i32) -> (i32, i32) {
    %c0_i32 = arith.constant 0 : i32
    %c0_i32_0 = arith.constant 0 : i32
    %c0_i32_1 = arith.constant 0 : i32
    return %c0_i32, %c0_i32_0 : i32, i32
  }
  func.func @transform_5(%arg0: i32) -> (i32, i32) {
    %c0_i32 = arith.constant 0 : i32
    %c0_i32_0 = arith.constant 0 : i32
    %c0_i32_1 = arith.constant 0 : i32
    return %c0_i32, %c0_i32_0 : i32, i32
  }
  func.func @transform_6(%arg0: i32) -> (i32, i32) {
    %c0_i32 = arith.constant 0 : i32
    %c0_i32_0 = arith.constant 0 : i32
    %c0_i32_1 = arith.constant 0 : i32
    return %c0_i32, %c0_i32_0 : i32, i32
  }
  func.func @transform_7(%arg0: i32) -> (i32, i32) {
    %c0_i32 = arith.constant 0 : i32
    %c0_i32_0 = arith.constant 0 : i32
    %c0_i32_1 = arith.constant 0 : i32
    return %c0_i32, %c0_i32_0 : i32, i32
  }
  func.func @transform_8(%arg0: i32) -> (i32, i32) {
    %c0_i32 = arith.constant 0 : i32
    %c0_i32_0 = arith.constant 0 : i32
    %c0_i32_1 = arith.constant 0 : i32
    return %c0_i32, %c0_i32_0 : i32, i32
  }
  func.func @transform_9(%arg0: i32) -> (i32, i32) {
    %c0_i32 = arith.constant 0 : i32
    %c0_i32_0 = arith.constant 0 : i32
    return %arg0, %c0_i32 : i32, i32
  }
}

</mosaic_0001>

<bundles_post_ra>
// kernel: tpu_custom_call.1
= control target key start
LH: loop header
LB: loop body
LE: loop exit
PB: predicated region body
PF: predicated region fallthrough
CT: control target
= control target key end

     0   :  { %14 = vsyncpa [#allocation3], 0  ;;  %s546_s0 = inlined_call_operand.hbm [shape: f32[8,96], index: 0, kind: input, shape index: {}]   ;;  %s547_s1 = inlined_call_operand.hbm [shape: f32[96,128], index: 1, kind: input, shape index: {}]   ;;  %s548_s2 = inlined_call_operand.vmem [shape: f32[1,128], index: 2, kind: input, shape index: {}]   ;;  %s549_s3 = inlined_call_operand.hbm [shape: f32[128,128], index: 3, kind: input, shape index: {}]   ;;  %s550_s4 = inlined_call_operand.vmem [shape: f32[1,128], index: 4, kind: input, shape index: {}]   ;;  %s551_s5 = inlined_call_operand.hbm [shape: f32[128,128], index: 5, kind: input, shape index: {}]   ;;  %s552_s6 = inlined_call_operand.vmem [shape: f32[1,128], index: 6, kind: input, shape index: {}]   ;;  %s553_s7 = inlined_call_operand.hbm [shape: f32[128,128], index: 7, kind: input, shape index: {}]   ;;  %s554_s8 = inlined_call_operand.vmem [shape: f32[1,128], index: 8, kind: input, shape index: {}]   ;;  %s555_s9 = inlined_call_operand.hbm [shape: f32[8,128], index: 9, kind: output, shape index: {}]  }
   0x1   :  { %15 = vsyncpa [#allocation6], 0 }
   0x2   :  { %16 = vsyncpa [#allocation9], 0  ;;  %s33_s11 = sshll.u32 %s547_s1, 4  ;;  %s34_s11 = int_to_ptr.hbm [resolvable:$true] %s33_s11 }
   0x3   :  { %17 = vsyncpa [#allocation4], 0  ;;  %s458_s12 = smov [#allocation5]   ;;  %s63_s16 = sshll.u32 %s551_s5, 4  ;;  %s64_s16 = int_to_ptr.hbm [resolvable:$true] %s63_s16 }
   0x4   :  { %s35_s13 = sshll.u32 %s458_s12, 4  ;;  %s459_s17 = smov 128   ;;  %s36_s13 = int_to_ptr.vmem [resolvable:$true] %s35_s13 }
   0x5   :  { %s460_s18 = smov 8   ;;  %s461_s19 = smov [#allocation8]  }
   0x6   :  { %41 = dma.hbm_to_vmem [thread:$0]  %s34_s11, 1536, %s36_s13, [#allocation6], %s459_s17, %s459_s17, %s460_s18  }
   0x7   :  { %s65_s20 = sshll.u32 %s461_s19, 4  ;;  %s23_s23 = sshll.u32 %s546_s0, 4  ;;  %s66_s20 = int_to_ptr.vmem [resolvable:$true] %s65_s20  ;;  %s24_s23 = int_to_ptr.hbm [resolvable:$true] %s23_s23 }
   0x8   :  { %71 = dma.hbm_to_vmem [thread:$0]  %s64_s16, 2048, %s66_s20, [#allocation9], %s459_s17, %s459_s17, %s460_s18  }
   0x9   :  { %s48_s25 = sshll.u32 %s549_s3, 4  ;;  %s462_s26 = smov [#allocation2]   ;;  %s49_s25 = int_to_ptr.hbm [resolvable:$true] %s48_s25 }
   0xa   :  { %s25_s27 = sshll.u32 %s462_s26, 4  ;;  %s463_s5 = smov [#allocation7]   ;;  %s26_s27 = int_to_ptr.vmem [resolvable:$true] %s25_s27 }
   0xb   :  { %28 = dma.hbm_to_vmem [thread:$0]  %s24_s23, 128, %s26_s27, [#allocation3]  }
   0xc   :  { %s50_s28 = sshll.u32 %s463_s5, 4  ;;  %s78_s10 = sshll.u32 %s553_s7, 4  ;;  %s51_s28 = int_to_ptr.vmem [resolvable:$true] %s50_s28  ;;  %s79_s10 = int_to_ptr.hbm [resolvable:$true] %s78_s10 }
   0xd   :  { %56 = dma.hbm_to_vmem [thread:$0]  %s49_s25, 2048, %s51_s28, [#allocation6], %s459_s17, %s459_s17, %s460_s18  }
   0xe   :  { %s464_s0 = smov [#allocation10]  }
   0xf   :  { %s80_s11 = sshll.u32 %s464_s0, 4  ;;  %s81_s11 = int_to_ptr.vmem [resolvable:$true] %s80_s11 }
  0x10   :  { %86 = dma.hbm_to_vmem [thread:$0]  %s79_s10, 2048, %s81_s11, [#allocation9], %s459_s17, %s459_s17, %s460_s18  }
  0x11   :  { %450 = dma.done.wait [#allocation3], 128  }
  0x12   :  { %451 = vsyncadd [#allocation3], 4294967168 }
  0x13   :  { %452 = dma.done.wait [#allocation6], 3584  }
  0x14   :  { %453 = vsyncadd [#allocation6], 4294963712 }
  0x15   :  { %454 = dma.done.wait [#allocation9], 4096  }
  0x16   :  { %455 = vsyncadd [#allocation9], 4294963200  ;;  %v121_v0 = vld [vmem:[#allocation5 + $0x58] sm:$0xff]  ;;  %v120_v1 = vld [vmem:[#allocation5 + $0x50] sm:$0xff]  ;;  %vm126_vm0 = vcmask 785408   ;;  %s465_s16 = smov [#allocation11]  }
  0x17   :  { %134 = vmatpush.msra.mxu0 %v121_v0  ;;  %v119_v2 = vld [vmem:[#allocation5 + $0x48] sm:$0xff]  ;;  %v118_v3 = vld [vmem:[#allocation5 + $0x40] sm:$0xff]  ;;  %v166_v4 = vld [vmem:[#allocation7 + $0x78] sm:$0xff]  ;;  %s279_s17 = sshll.u32 %s465_s16, 4  ;;  %s281_s20 = sshll.u32 %s555_s9, 4  ;;  %s280_s17 = int_to_ptr.vmem [resolvable:$true] %s279_s17  ;;  %s282_s20 = int_to_ptr.hbm [resolvable:$true] %s281_s20 }
  0x18   :  { %v165_v5 = vld [vmem:[#allocation7 + $0x70] sm:$0xff]  ;;  %171 = vmatpush.msra.mxu1 %v166_v4  ;;  %v117_v6 = vld [vmem:[#allocation5 + $0x38] sm:$0xff]  ;;  %v164_v7 = vld [vmem:[#allocation7 + $0x68] sm:$0xff] }
  0x19   :  { %135 = vmatpush.msra.mxu0 %v120_v1  ;;  %v116_v8 = vld [vmem:[#allocation5 + $0x30] sm:$0xff]  ;;  %v163_v9 = vld [vmem:[#allocation7 + $0x60] sm:$0xff]  ;;  %v115_v10 = vld [vmem:[#allocation5 + $0x28] sm:$0xff] }
  0x1a   :  { %172 = vmatpush.msra.mxu1 %v165_v5  ;;  %v162_v11 = vld [vmem:[#allocation7 + $0x58] sm:$0xff]  ;;  %v114_v12 = vld [vmem:[#allocation5 + $0x20] sm:$0xff]  ;;  %v161_v13 = vld [vmem:[#allocation7 + $0x50] sm:$0xff] }
  0x1b   :  { %136 = vmatpush.msra.mxu0 %v119_v2  ;;  %v113_v14 = vld [vmem:[#allocation5 + $0x18] sm:$0xff]  ;;  %v160_v15 = vld [vmem:[#allocation7 + $0x48] sm:$0xff]  ;;  %v112_v16 = vld [vmem:[#allocation5 + $0x10] sm:$0xff] }
  0x1c   :  { %173 = vmatpush.msra.mxu1 %v164_v7  ;;  %v159_v17 = vld [vmem:[#allocation7 + $0x40] sm:$0xff]  ;;  %v111_v18 = vld [vmem:[#allocation5 + $0x8] sm:$0xff]  ;;  %v158_v19 = vld [vmem:[#allocation7 + $0x38] sm:$0xff] }
  0x1d   :  { %137 = vmatpush.msra.mxu0 %v118_v3  ;;  %v110_v20 = vld [vmem:[#allocation5] sm:$0xff]  ;;  %v157_v21 = vld [vmem:[#allocation7 + $0x30] sm:$0xff]  ;;  %v109_v22 = vld [vmem:[#allocation2] sm:$0xff] }
  0x1e   :  { %174 = vmatpush.msra.mxu1 %v163_v9  ;;  %v156_v23 = vld [vmem:[#allocation7 + $0x28] sm:$0xff]  ;;  %v155_v24 = vld [vmem:[#allocation7 + $0x20] sm:$0xff]  ;;  %v154_v25 = vld [vmem:[#allocation7 + $0x18] sm:$0xff] }
  0x1f   :  { %138 = vmatpush.msra.mxu0 %v117_v6  ;;  %v153_v26 = vld [vmem:[#allocation7 + $0x10] sm:$0xff]  ;;  %v152_v27 = vld [vmem:[#allocation7 + $0x8] sm:$0xff]  ;;  %v151_v28 = vld [vmem:[#allocation7] sm:$0xff] }
  0x20   :  { %175 = vmatpush.msra.mxu1 %v162_v11  ;;  %v207_v29 = vld [vmem:[#allocation8 + $0x78] sm:$0xff]  ;;  %v206_v30 = vld [vmem:[#allocation8 + $0x70] sm:$0xff]  ;;  %v205_v31 = vld [vmem:[#allocation8 + $0x68] sm:$0xff] }
  0x21   :  { %139 = vmatpush.msra.mxu0 %v116_v8  ;;  %212 = vmatpush.msra.mxu2 %v207_v29  ;;  %v204_v32 = vld [vmem:[#allocation8 + $0x60] sm:$0xff]  ;;  %v203_v33 = vld [vmem:[#allocation8 + $0x58] sm:$0xff]  ;;  %v202_v34 = vld [vmem:[#allocation8 + $0x50] sm:$0xff] }
  0x22   :  { %176 = vmatpush.msra.mxu1 %v161_v13  ;;  %v201_v35 = vld [vmem:[#allocation8 + $0x48] sm:$0xff]  ;;  %v200_v36 = vld [vmem:[#allocation8 + $0x40] sm:$0xff]  ;;  %v199_v37 = vld [vmem:[#allocation8 + $0x38] sm:$0xff] }
  0x23   :  { %140 = vmatpush.msra.mxu0 %v115_v10  ;;  %213 = vmatpush.msra.mxu2 %v206_v30  ;;  %v198_v38 = vld [vmem:[#allocation8 + $0x30] sm:$0xff]  ;;  %v197_v39 = vld [vmem:[#allocation8 + $0x28] sm:$0xff]  ;;  %v196_v40 = vld [vmem:[#allocation8 + $0x20] sm:$0xff] }
  0x24   :  { %177 = vmatpush.msra.mxu1 %v160_v15  ;;  %v195_v41 = vld [vmem:[#allocation8 + $0x18] sm:$0xff]  ;;  %v194_v46 = vld [vmem:[#allocation8 + $0x10] sm:$0xff]  ;;  %v193_v47 = vld [vmem:[#allocation8 + $0x8] sm:$0xff] }
  0x25   :  { %141 = vmatpush.msra.mxu0 %v114_v12  ;;  %214 = vmatpush.msra.mxu2 %v205_v31  ;;  %v302_v42 = vld [vmem:[%s548_s2] ss:$0 sm:$0xff]  ;;  %v192_v48 = vld [vmem:[#allocation8] sm:$0xff]  ;;  %v247_v50 = vld [vmem:[#allocation10 + $0x70] sm:$0xff] }
  0x26   :  { %178 = vmatpush.msra.mxu1 %v159_v17  ;;  %v248_v49 = vld [vmem:[#allocation10 + $0x78] sm:$0xff]  ;;  %v246_v51 = vld [vmem:[#allocation10 + $0x68] sm:$0xff]  ;;  %v245_v52 = vld [vmem:[#allocation10 + $0x60] sm:$0xff] }
  0x27   :  { %142 = vmatpush.msra.mxu0 %v113_v14  ;;  %215 = vmatpush.msra.mxu2 %v204_v32  ;;  %v244_v53 = vld [vmem:[#allocation10 + $0x58] sm:$0xff]  ;;  %v243_v54 = vld [vmem:[#allocation10 + $0x50] sm:$0xff]  ;;  %v242_v55 = vld [vmem:[#allocation10 + $0x48] sm:$0xff] }
  0x28   :  { %179 = vmatpush.msra.mxu1 %v158_v19  ;;  %253 = vmatpush.msra.mxu3 %v248_v49  ;;  %v241_v56 = vld [vmem:[#allocation10 + $0x40] sm:$0xff]  ;;  %v240_v57 = vld [vmem:[#allocation10 + $0x38] sm:$0xff]  ;;  %v239_v58 = vld [vmem:[#allocation10 + $0x30] sm:$0xff] }
  0x29   :  { %143 = vmatpush.msra.mxu0 %v112_v16  ;;  %216 = vmatpush.msra.mxu2 %v203_v33  ;;  %v238_v59 = vld [vmem:[#allocation10 + $0x28] sm:$0xff]  ;;  %v237_v60 = vld [vmem:[#allocation10 + $0x20] sm:$0xff]  ;;  %v236_v61 = vld [vmem:[#allocation10 + $0x18] sm:$0xff] }
  0x2a   :  { %180 = vmatpush.msra.mxu1 %v157_v21  ;;  %254 = vmatpush.msra.mxu3 %v247_v50  ;;  %v303_v62 = vld [vmem:[%s550_s4] ss:$0 sm:$0xff]  ;;  %v235_v2 = vld [vmem:[#allocation10 + $0x10] sm:$0xff]  ;;  %v234_v3 = vld [vmem:[#allocation10 + $0x8] sm:$0xff] }
  0x2b   :  { %144 = vmatpush.msra.mxu0 %v111_v18  ;;  %217 = vmatpush.msra.mxu2 %v202_v34  ;;  %v233_v4 = vld [vmem:[#allocation10] sm:$0xff]  ;;  %v304_v5 = vld [vmem:[%s552_s6] ss:$0 sm:$0xff] }
  0x2c   :  { %181 = vmatpush.msra.mxu1 %v156_v23  ;;  %255 = vmatpush.msra.mxu3 %v246_v51  ;;  %v305_v9 = vld [vmem:[%s554_s8] ss:$0 sm:$0xff] }
  0x2d   :  { %145 = vmatpush.msra.mxu0 %v110_v20  ;;  %218 = vmatpush.msra.mxu2 %v201_v35 }
  0x2e   :  { %293 = vmatmul.msk.f32.vlgmr.msra.gmra.mxu0 %vm126_vm0, %v109_v22  ;;  %182 = vmatpush.msra.mxu1 %v155_v24 }
  0x2f   :  { %219 = vmatpush.msra.mxu2 %v200_v36  ;;  %256 = vmatpush.msra.mxu3 %v245_v52 }
  0x30   :  { %183 = vmatpush.msra.mxu1 %v154_v25 }
  0x31   :  { %220 = vmatpush.msra.mxu2 %v199_v37  ;;  %257 = vmatpush.msra.mxu3 %v244_v53 }
  0x32   :  { %184 = vmatpush.msra.mxu1 %v153_v26 }
  0x33   :  { %221 = vmatpush.msra.mxu2 %v198_v38  ;;  %258 = vmatpush.msra.mxu3 %v243_v54 }
  0x34   :  { %185 = vmatpush.msra.mxu1 %v152_v27 }
  0x35   :  { %222 = vmatpush.msra.mxu2 %v197_v39  ;;  %259 = vmatpush.msra.mxu3 %v242_v55 }
  0x36   :  { %186 = vmatpush.msra.mxu1 %v151_v28 }
  0x37   :  { %223 = vmatpush.msra.mxu2 %v196_v40  ;;  %260 = vmatpush.msra.mxu3 %v241_v56 }
  0x39   :  { %224 = vmatpush.msra.mxu2 %v195_v41  ;;  %261 = vmatpush.msra.mxu3 %v240_v57 }
  0x3b   :  { %225 = vmatpush.msra.mxu2 %v194_v46  ;;  %262 = vmatpush.msra.mxu3 %v239_v58 }
  0x3d   :  { %226 = vmatpush.msra.mxu2 %v193_v47  ;;  %263 = vmatpush.msra.mxu3 %v238_v59 }
  0x3f   :  { %227 = vmatpush.msra.mxu2 %v192_v48  ;;  %264 = vmatpush.msra.mxu3 %v237_v60 }
  0x41   :  { %265 = vmatpush.msra.mxu3 %v236_v61 }
  0x43   :  { %266 = vmatpush.msra.mxu3 %v235_v2 }
  0x45   :  { %267 = vmatpush.msra.mxu3 %v234_v3 }
  0x47   :  { %268 = vmatpush.msra.mxu3 %v233_v4 }
  0xab   :  { %v147_v43 = vpop.f32.mrf.mxu0 }
  0xac   :  { %v148_v44 = vadd.f32 %v302_v42, %v147_v43 }
  0xae   :  { %v150_v45 = vmax.f32 %v148_v44, 0.0 }
  0xb0   :  { %187 = vmatmul.f32.vlgmr.msra.gmra.mxu1 %v150_v45 }
 0x12d   :  { %v188_v63 = vpop.f32.mrf.mxu1 }
 0x12e   :  { %v189_v0 = vadd.f32 %v303_v62, %v188_v63 }
 0x130   :  { %v191_v1 = vmax.f32 %v189_v0, 0.0 }
 0x132   :  { %228 = vmatmul.f32.vlgmr.msra.gmra.mxu2 %v191_v1 }
 0x1b5   :  { %v229_v6 = vpop.f32.mrf.mxu2 }
 0x1b6   :  { %v230_v7 = vadd.f32 %v304_v5, %v229_v6 }
 0x1b8   :  { %v232_v8 = vmax.f32 %v230_v7, 0.0 }
 0x1ba   :  { %269 = vmatmul.f32.vlgmr.msra.gmra.mxu3 %v232_v8 }
 0x23d   :  { %v270_v10 = vpop.f32.mrf.mxu3 }
 0x23e   :  { %v271_v11 = vadd.f32 %v305_v9, %v270_v10 }
 0x240   :  { %273 = vst [vmem:[#allocation11] sm:$0xff] %v271_v11 }
 0x241   :  { %284 = dma.vmem_to_hbm [thread:$0]  %s280_s17, 128, %s282_s20, [#allocation4]  }
 0x242   :  { %456 = dma.done.wait [#allocation4], 128  }
 0x243   :  { %457 = vsyncadd [#allocation4], 4294967168 }
 0x244   :  { %289 = vsyncpa [#allocation3], 1 }
 0x245   :  { %290 = vsyncpa [#allocation6], 1 }
 0x246   :  { %291 = vsyncpa [#allocation9], 1 }
 0x247   :  { %292 = vsyncpa [#allocation4], 1 }

</bundles_post_ra>
